<compile_context>
chip_gen: v6e
topology: v6e:2x2x1
jax: 0.10.0
libtpu: 0.0.40
codegen_flags: <defaults>
</compile_context>

<pallas_src>
import jax
import jax.numpy as jnp
from jax.experimental import pallas as pl
from jax.experimental.pallas import tpu as pltpu


def _round_up(x, m):
    return ((x + m - 1) // m) * m


def _fusion_kernel(x_ref, r_ref, wx_ref, wr_ref, b_ref, o_ref):
    # x_ref : (tm, H)   activation tile
    # r_ref : (tm, R)   residual-feature tile
    # wx_ref: (H, tn)   weight slice for x        (pre-transposed [in, out])
    # wr_ref: (R, tn)   weight slice for residual (pre-transposed [in, out])
    # b_ref : (1, tn)   bias tile
    # o_ref : (tm, tn)  output tile
    acc = jnp.dot(x_ref[...], wx_ref[...], preferred_element_type=jnp.float32)
    acc = acc + jnp.dot(r_ref[...], wr_ref[...],
                        preferred_element_type=jnp.float32)
    o_ref[...] = (acc + b_ref[...].astype(jnp.float32)).astype(o_ref.dtype)


def _vmem_budget_bytes():
    """Generation-aware (tile budget, vmem_limit) in bytes."""
    try:
        cap = int(pltpu.get_tpu_info().vmem_capacity_bytes)
        if cap <= 0:
            raise ValueError("bad vmem capacity")
    except Exception:
        cap = 64 << 20          # conservative fallback: v7x per-TC VMEM
    budget = (cap * 7) // 10    # double-buffered tile working set
    limit = cap - (8 << 20)     # leave headroom for Mosaic internal scratch
    return budget, limit


def _pick_tiles(M, Np, H, R, act_item, w_item, out_item, budget):
    """Pick (tm, tn) so the double-buffered working set fits `budget`.

    tn is kept as wide as possible (tn == Np => the weight streams from HBM
    exactly once) and never drops below 256 before tm does (keeps the
    2x256^2 MXU on v6e/v7x full); the tm floor is dtype-aware.
    """
    K = H + R
    min_tm = {1: 32, 2: 16}.get(act_item, 8)

    def usage(tm, tn):
        # 2x double buffering on every pipelined operand + output tile,
        # per-operand itemsizes (weights may be wider than activations).
        return 2 * (tm * K * act_item        # x + r tiles
                    + tn * K * w_item        # Wx + Wr tiles
                    + tn * w_item            # bias tile
                    + tm * tn * out_item)    # output tile

    # 1) N tile: full padded width if it fits ~half the budget, otherwise the
    #    widest multiple of 128 (floored at 256, then 128 as a last resort).
    tn = Np
    while tn > 256 and usage(min_tm, tn) > budget // 2:
        tn = max(256, _round_up(tn // 2, 128))
    if tn > 128 and usage(min_tm, tn) > budget // 2:
        tn = 128

    # 2) M tile: as large as the remaining budget allows.
    tm = min(M, 1024)
    if tm != M:
        tm = max(min_tm, (tm // min_tm) * min_tm)
    while tm > min_tm and usage(tm, tn) > budget:
        tm = max(min_tm, _round_up(tm // 2, min_tm))

    # TODO(synk): K-tiled (extra grid axis + f32 accumulator scratch) fallback
    # for extremely wide fusions (H + R on the order of 20k+ features) where
    # even (min_tm, 128) tiles exceed the budget.
    return tm, tn


def residual_fusion_forward(x, residual_features, weight, bias):
    """ResidualFusion.forward ('cross_attention' / 'dense' — identical math).

    x                 : [B, S, H]
    residual_features : [B, S, R]
    weight            : [H, H + R]   (PyTorch nn.Linear [out, in] layout)
    bias              : [H]
    returns           : [B, S, H]
    """
    B, S, H = x.shape
    R = residual_features.shape[-1]
    M = B * S
    K = H + R
    Np = _round_up(H, 128)

    act_item = jnp.dtype(x.dtype).itemsize
    w_item = jnp.dtype(weight.dtype).itemsize
    out_item = act_item

    budget, vmem_limit = _vmem_budget_bytes()
    tm, tn = _pick_tiles(M, Np, H, R, act_item, w_item, out_item, budget)

    # Output layout: pad the lane dim to 128 only when H < 128 (keeps every
    # store an unmasked lane-dense vst). For H >= 128 write [M, H] directly so
    # at most the edge N tile uses masked stores and no post-kernel slice /
    # extra HBM pass over the output is needed.
    out_N = Np if H < 128 else H
    gm = pl.cdiv(M, tm)
    gn = pl.cdiv(out_N, tn)
    Nw = gn * tn                      # padded weight/bias width (full blocks)

    # Flatten leading dims (contiguous reshape, no copy).
    x2 = x.reshape(M, H)
    r2 = residual_features.reshape(M, R)

    # Parameter prep (split + transpose to [in, out] + pad) — one-time work on
    # the small weight in a real model; never touches the activations. The
    # [K, N] layout maps straight onto the MXU and is lane-dense in N.
    wx = weight[:, :H].T              # (H, H)
    wr = weight[:, H:].T              # (R, H)
    if Nw != H:
        wx = jnp.pad(wx, ((0, 0), (0, Nw - H)))
        wr = jnp.pad(wr, ((0, 0), (0, Nw - H)))
        b_p = jnp.pad(bias, (0, Nw - H))
    else:
        b_p = bias
    b2 = b_p.reshape(1, Nw)

    # Grid order: keep the larger operand VMEM-resident across the inner axis.
    # With tn == Np (common case) gn == 1 and the weight streams exactly once
    # either way. When N is outer it is also the axis the v7x megacore shards,
    # so each TensorCore streams only its half of the weight.
    w_bytes = (K + 1) * Nw * w_item
    a_bytes = M * K * act_item
    o_bytes = M * out_N * out_item
    traffic_m_outer = a_bytes + gm * w_bytes   # activations resident
    traffic_n_outer = w_bytes + gn * a_bytes   # weight resident
    n_outer = traffic_n_outer < traffic_m_outer

    if n_outer:
        grid = (gn, gm)
        x_map = lambda j, i: (i, 0)
        w_map = lambda j, i: (0, j)
        b_map = lambda j, i: (0, j)
        o_map = lambda j, i: (i, j)
    else:
        grid = (gm, gn)
        x_map = lambda i, j: (i, 0)
        w_map = lambda i, j: (0, j)
        b_map = lambda i, j: (0, j)
        o_map = lambda i, j: (i, j)

    cost = pl.CostEstimate(
        flops=2 * M * Nw * K,
        transcendentals=0,
        bytes_accessed=min(traffic_m_outer, traffic_n_outer) + o_bytes,
    )

    out = pl.pallas_call(
        _fusion_kernel,
        out_shape=jax.ShapeDtypeStruct((M, out_N), x.dtype),
        grid_spec=pltpu.PrefetchScalarGridSpec(
            num_scalar_prefetch=0,
            grid=grid,
            in_specs=[
                pl.BlockSpec((tm, H), x_map),    # x tile
                pl.BlockSpec((tm, R), x_map),    # residual tile
                pl.BlockSpec((H, tn), w_map),    # Wx tile ([in, out])
                pl.BlockSpec((R, tn), w_map),    # Wr tile ([in, out])
                pl.BlockSpec((1, tn), b_map),    # bias tile
            ],
            out_specs=pl.BlockSpec((tm, tn), o_map),
        ),
        compiler_params=pltpu.CompilerParams(
            dimension_semantics=("parallel", "parallel"),
            vmem_limit_bytes=vmem_limit,
        ),
        cost_estimate=cost,
    )(x2, r2, wx, wr, b2)

    if out_N != H:
        out = out[:, :H]
    return out.reshape(B, S, H)


if __name__ == "__main__":
    B, S = 2, 8
    hidden_channels = 32
    residual_feature_dim = 16

    key = jax.random.PRNGKey(0)
    k_x, k_r, k_w, k_b = jax.random.split(key, 4)

    x = jax.random.normal(k_x, (B, S, hidden_channels), dtype=jnp.float32)
    residual = jax.random.normal(
        k_r, (B, S, residual_feature_dim), dtype=jnp.float32)

    # Deterministic nn.Linear-style init: U(-1/sqrt(fan_in), 1/sqrt(fan_in)).
    fan_in = hidden_channels + residual_feature_dim
    bound = 1.0 / (fan_in ** 0.5)
    weight = jax.random.uniform(
        k_w, (hidden_channels, fan_in), dtype=jnp.float32,
        minval=-bound, maxval=bound)
    bias = jax.random.uniform(
        k_b, (hidden_channels,), dtype=jnp.float32,
        minval=-bound, maxval=bound)

    out = residual_fusion_forward(x, residual, weight, bias)
    out = jax.block_until_ready(out)

    # Reference check against plain JAX (same math as the PyTorch module).
    ref = jnp.concatenate([x, residual], axis=-1) @ weight.T + bias
    assert out.shape == (B, S, hidden_channels)
    assert jnp.allclose(out, ref, atol=1e-5, rtol=1e-5)

    print("KERNEL_OK")
</pallas_src>

<mosaic_0001>
module attributes {stable_mosaic.version = 11 : i64} {
  func.func @_fusion_kernel(%arg0: i32, %arg1: i32, %arg2: memref<16x32xf32, #tpu.memory_space<vmem>>, %arg3: memref<16x16xf32, #tpu.memory_space<vmem>>, %arg4: memref<32x128xf32, #tpu.memory_space<vmem>>, %arg5: memref<16x128xf32, #tpu.memory_space<vmem>>, %arg6: memref<1x128xf32, #tpu.memory_space<vmem>>, %arg7: memref<16x128xf32, #tpu.memory_space<vmem>>) attributes {dimension_semantics = [#tpu.dimension_semantics<parallel>, #tpu.dimension_semantics<parallel>], iteration_bounds = array<i64: 1, 1>, scalar_prefetch = 0 : i64, scratch_operands = 0 : i64, tpu.core_type = #tpu.core_type<tc>, window_params = [{transform_indices = @transform_0, window_bounds = array<i64: 16, 32>}, {transform_indices = @transform_1, window_bounds = array<i64: 16, 16>}, {transform_indices = @transform_2, window_bounds = array<i64: 32, 128>}, {transform_indices = @transform_3, window_bounds = array<i64: 16, 128>}, {transform_indices = @transform_4, window_bounds = array<i64: 1, 128>}, {transform_indices = @transform_5, window_bounds = array<i64: 16, 128>}]} {
    %c0 = arith.constant 0 : index
    %c0_0 = arith.constant 0 : index
    %0 = vector.load %arg2[%c0, %c0_0] : memref<16x32xf32, #tpu.memory_space<vmem>>, vector<16x32xf32>
    %c0_1 = arith.constant 0 : index
    %c0_2 = arith.constant 0 : index
    %1 = vector.load %arg4[%c0_1, %c0_2] : memref<32x128xf32, #tpu.memory_space<vmem>>, vector<32x128xf32>
    %cst = arith.constant dense<0.000000e+00> : vector<16x128xf32>
    %2 = tpu.matmul %0, %1, %cst {dimension_numbers = #tpu.dot_dimension_numbers<[1], [0], [0], [1], [0, 0, 1, 1], [], []>} : vector<16x32xf32>, vector<32x128xf32>, vector<16x128xf32> -> vector<16x128xf32>
    %c0_3 = arith.constant 0 : index
    %c0_4 = arith.constant 0 : index
    %3 = vector.load %arg3[%c0_3, %c0_4] : memref<16x16xf32, #tpu.memory_space<vmem>>, vector<16x16xf32>
    %c0_5 = arith.constant 0 : index
    %c0_6 = arith.constant 0 : index
    %4 = vector.load %arg5[%c0_5, %c0_6] : memref<16x128xf32, #tpu.memory_space<vmem>>, vector<16x128xf32>
    %cst_7 = arith.constant dense<0.000000e+00> : vector<16x128xf32>
    %5 = tpu.matmul %3, %4, %cst_7 {dimension_numbers = #tpu.dot_dimension_numbers<[1], [0], [0], [1], [0, 0, 1, 1], [], []>} : vector<16x16xf32>, vector<16x128xf32>, vector<16x128xf32> -> vector<16x128xf32>
    %6 = arith.addf %2, %5 : vector<16x128xf32>
    %c0_8 = arith.constant 0 : index
    %c0_9 = arith.constant 0 : index
    %7 = vector.load %arg6[%c0_8, %c0_9] : memref<1x128xf32, #tpu.memory_space<vmem>>, vector<1x128xf32>
    %8 = vector.broadcast %7 : vector<1x128xf32> to vector<16x128xf32>
    %9 = arith.addf %6, %8 : vector<16x128xf32>
    %c0_10 = arith.constant 0 : index
    %c0_11 = arith.constant 0 : index
    %10 = vector.load %arg7[%c0_10, %c0_11] : memref<16x128xf32, #tpu.memory_space<vmem>>, vector<16x128xf32>
    tpu.vector_store %arg7[%c0_10, %c0_11], %9 {strides = array<i32>} : memref<16x128xf32, #tpu.memory_space<vmem>>, vector<16x128xf32>,
    return
  }
  func.func @transform_0(%arg0: i32, %arg1: i32) -> (i32, i32) {
    %c0_i32 = arith.constant 0 : i32
    %c0_i32_0 = arith.constant 0 : i32
    return %arg0, %c0_i32 : i32, i32
  }
  func.func @transform_1(%arg0: i32, %arg1: i32) -> (i32, i32) {
    %c0_i32 = arith.constant 0 : i32
    %c0_i32_0 = arith.constant 0 : i32
    return %arg0, %c0_i32 : i32, i32
  }
  func.func @transform_2(%arg0: i32, %arg1: i32) -> (i32, i32) {
    %c0_i32 = arith.constant 0 : i32
    %c0_i32_0 = arith.constant 0 : i32
    return %c0_i32, %arg1 : i32, i32
  }
  func.func @transform_3(%arg0: i32, %arg1: i32) -> (i32, i32) {
    %c0_i32 = arith.constant 0 : i32
    %c0_i32_0 = arith.constant 0 : i32
    return %c0_i32, %arg1 : i32, i32
  }
  func.func @transform_4(%arg0: i32, %arg1: i32) -> (i32, i32) {
    %c0_i32 = arith.constant 0 : i32
    %c0_i32_0 = arith.constant 0 : i32
    return %c0_i32, %arg1 : i32, i32
  }
  func.func @transform_5(%arg0: i32, %arg1: i32) -> (i32, i32) {
    %c0_i32 = arith.constant 0 : i32
    return %arg0, %arg1 : i32, i32
  }
}

</mosaic_0001>

<bundles_post_ra>
// kernel: tpu_custom_call.1
= control target key start
LH: loop header
LB: loop body
LE: loop exit
PB: predicated region body
PF: predicated region fallthrough
CT: control target
= control target key end

     0   :  { %10 = vsyncpa [#allocation3], 0  ;;  %s498_s0 = inlined_call_operand.hbm [shape: f32[16,32], index: 0, kind: input, shape index: {}]   ;;  %s499_s1 = inlined_call_operand.hbm [shape: f32[16,16], index: 1, kind: input, shape index: {}]   ;;  %s500_s2 = inlined_call_operand.hbm [shape: f32[32,128], index: 2, kind: input, shape index: {}]   ;;  %s501_s3 = inlined_call_operand.hbm [shape: f32[16,128], index: 3, kind: input, shape index: {}]   ;;  %s502_s4 = inlined_call_operand.vmem [shape: f32[1,128], index: 4, kind: input, shape index: {}]   ;;  %s503_s5 = inlined_call_operand.hbm [shape: f32[16,128], index: 5, kind: output, shape index: {}]  }
   0x1   :  { %11 = vsyncpa [#allocation6], 0 }
   0x2   :  { %12 = vsyncpa [#allocation9], 0 }
   0x3   :  { %13 = vsyncpa [#allocation4], 0  ;;  %s428_s18 = smov [#allocation5]   ;;  %s429_s20 = smov [#allocation2]  }
   0x4   :  { %s31_s19 = sshll.u32 %s428_s18, 4  ;;  %s19_s21 = sshll.u32 %s429_s20, 4  ;;  %s32_s19 = int_to_ptr.vmem [resolvable:$true] %s31_s19  ;;  %s20_s21 = int_to_ptr.vmem [resolvable:$true] %s19_s21 }
   0x5   :  { %s328_s22 = scalar_lea.vmem %s32_s19, 256  ;;  %p333_p1 = scmp.lt.s32.totalorder %s32_s19, %s32_s19 }
   0x6   :  { %p329_p0 = scmp.ne.s32.totalorder %s32_s19, %s328_s22  ;;  %p334_p2 = scmp.lt.s32.totalorder %s328_s22, %s328_s22 }
   0x8   :  { %p335_p3 = por %p334_p2, %p333_p1 }
   0xa   :  { %p336_p4 = pnand %p335_p3, %p329_p0 }
   0xc   :  { %339 = shalt.err (!%p336_p4)
}
   0xd   :  { %s430_s23 = smov 128   ;;  %s431_s24 = smov 8  }
   0xe   :  { %37 = dma.hbm_to_vmem [thread:$0]  %s499_s1, 256, %s32_s19, [#allocation6], %s430_s23, %s430_s23, %s431_s24  }
   0xf   :  { %s348_s27 = scalar_lea.vmem %s20_s21, 256  ;;  %p353_p6 = scmp.lt.s32.totalorder %s20_s21, %s20_s21 }
  0x10   :  { %p349_p5 = scmp.ne.s32.totalorder %s20_s21, %s348_s27  ;;  %p354_p7 = scmp.lt.s32.totalorder %s348_s27, %s348_s27 }
  0x12   :  { %p355_p8 = por %p354_p7, %p353_p6 }
  0x14   :  { %p356_p9 = pnand %p355_p8, %p349_p5 }
  0x16   :  { %359 = shalt.err (!%p356_p9)
}
  0x17   :  { %25 = dma.hbm_to_vmem [thread:$0]  %s498_s0, 256, %s20_s21, [#allocation3], %s430_s23, %s430_s23, %s431_s24  }
  0x18   :  { %s432_s30 = smov [#allocation7]   ;;  %s433_s7 = smov [#allocation8]  }
  0x19   :  { %s43_s6 = sshll.u32 %s432_s30, 4  ;;  %s55_s8 = sshll.u32 %s433_s7, 4  ;;  %s44_s6 = int_to_ptr.vmem [resolvable:$true] %s43_s6  ;;  %s56_s8 = int_to_ptr.vmem [resolvable:$true] %s55_s8 }
  0x1a   :  { %s368_s1 = scalar_lea.vmem %s44_s6, 512  ;;  %p373_p11 = scmp.lt.s32.totalorder %s44_s6, %s44_s6 }
  0x1b   :  { %p369_p10 = scmp.ne.s32.totalorder %s44_s6, %s368_s1  ;;  %p374_p12 = scmp.lt.s32.totalorder %s368_s1, %s368_s1 }
  0x1d   :  { %p375_p13 = por %p374_p12, %p373_p11 }
  0x1f   :  { %p376_p0 = pnand %p375_p13, %p369_p10 }
  0x21   :  { %379 = shalt.err (!%p376_p0)
}
  0x22   :  { %49 = dma.hbm_to_vmem [thread:$0]  %s500_s2, 512, %s44_s6, [#allocation6], %s430_s23, %s430_s23, %s431_s24  }
  0x23   :  { %s388_s0 = scalar_lea.vmem %s56_s8, 256  ;;  %p393_p2 = scmp.lt.s32.totalorder %s56_s8, %s56_s8 }
  0x24   :  { %p389_p1 = scmp.ne.s32.totalorder %s56_s8, %s388_s0  ;;  %p394_p3 = scmp.lt.s32.totalorder %s388_s0, %s388_s0 }
  0x26   :  { %p395_p4 = por %p394_p3, %p393_p2 }
  0x28   :  { %p396_p5 = pnand %p395_p4, %p389_p1 }
  0x2a   :  { %399 = shalt.err (!%p396_p5)
}
  0x2b   :  { %61 = dma.hbm_to_vmem [thread:$0]  %s501_s3, 256, %s56_s8, [#allocation9], %s430_s23, %s430_s23, %s431_s24  }
  0x2c   :  { %420 = dma.done.wait [#allocation3], 256  }
  0x2d   :  { %421 = vsyncadd [#allocation3], 4294967040 }
  0x2e   :  { %422 = dma.done.wait [#allocation6], 768  }
  0x2f   :  { %423 = vsyncadd [#allocation6], 4294966528 }
  0x30   :  { %424 = dma.done.wait [#allocation9], 256  }
  0x31   :  { %425 = vsyncadd [#allocation9], 4294967040  ;;  %v81_v0 = vld [vmem:[#allocation7 + $0x18] sm:$0xff]  ;;  %v85_v1 = vld [vmem:[#allocation8 + $0x8] sm:$0xff]  ;;  %vm86_vm0 = vcmask 130048   ;;  %vm168_vm1 = vcmask 261120  }
  0x32   :  { %v80_v2 = vld [vmem:[#allocation7 + $0x10] sm:$0xff]  ;;  %302 = vmatprep.subr.mxu1 %v81_v0  ;;  %295 = vmatprep.subr.mxu0 %v85_v1  ;;  %v84_v3 = vld [vmem:[#allocation8] sm:$0xff]  ;;  %v79_v4 = vld [vmem:[#allocation7 + $0x8] sm:$0xff]  ;;  %s434_s13 = smov [#allocation10]  }
  0x33   :  { %303 = vmatpush3.msra.mxu1 %v81_v0  ;;  %296 = vmatpush3.msra.mxu0 %v85_v1  ;;  %v82_v5 = vld [vmem:[#allocation5] sm:$0xff]  ;;  %v83_v6 = vld [vmem:[#allocation5 + $0x8] sm:$0xff]  ;;  %v78_v7 = vld [vmem:[#allocation7] sm:$0xff]  ;;  %s266_s14 = sshll.u32 %s434_s13, 4  ;;  %s267_s14 = int_to_ptr.vmem [resolvable:$true] %s266_s14 }
  0x34   :  { %304 = vmatprep.subr.mxu1 %v80_v2  ;;  %297 = vmatprep.subr.mxu0 %v84_v3  ;;  %v76_v8 = vld [vmem:[#allocation2] sm:$0xff]  ;;  %v77_v9 = vld [vmem:[#allocation2 + $0x8] sm:$0xff]  ;;  %s400_s15 = scalar_lea.vmem %s267_s14, 256  ;;  %p405_p7 = scmp.lt.s32.totalorder %s267_s14, %s267_s14 }
  0x35   :  { %305 = vmatpush3.msra.mxu1 %v80_v2  ;;  %298 = vmatpush3.msra.mxu0 %v84_v3  ;;  %v284_v12 = vld [vmem:[%s502_s4] ss:$0 sm:$0xff]  ;;  %p401_p6 = scmp.ne.s32.totalorder %s267_s14, %s400_s15  ;;  %p406_p8 = scmp.lt.s32.totalorder %s400_s15, %s400_s15 }
  0x36   :  { %306 = vmatprep.subr.mxu1 %v79_v4  ;;  %299 = vmatprep.mubr.msk.f32.mxu0 %vm86_vm0, %v82_v5 }
  0x37   :  { %307 = vmatpush3.msra.mxu1 %v79_v4  ;;  %300 = vmatmul.mubr.msk.f32.vlgmr.msra.gmra.mxu0 %vm86_vm0, %v83_v6  ;;  %p407_p9 = por %p406_p8, %p405_p7 }
  0x38   :  { %308 = vmatprep.subr.mxu1 %v78_v7  ;;  %310 = vmatprep.mubr.msk.f32.mxu1 %vm168_vm1, %v76_v8 }
  0x39   :  { %309 = vmatpush3.msra.mxu1 %v78_v7  ;;  %p408_p10 = pnand %p407_p9, %p401_p6 }
  0x3a   :  { %311 = vmatmul.mubr.msk.f32.vlgmr.msra.gmra.mxu1 %vm168_vm1, %v77_v9 }
  0xf7   :  { %v301_v10 = vpop.f32.mrf.mxu0 }
  0xf9   :  { %v159_v14 = vpop.f32.mrf.mxu0 }
  0xfa   :  { %v312_v11 = vpop.f32.mrf.mxu1 }
  0xfb   :  { %v247_v13 = vadd.f32 %v312_v11, %v301_v10 }
  0xfc   :  { %v241_v15 = vpop.f32.mrf.mxu1 }
  0xfd   :  { %v258_v16 = vadd.f32 %v284_v12, %v247_v13  ;;  %v242_v17 = vadd.f32 %v241_v15, %v159_v14 }
  0xff   :  { %260 = vst [vmem:[#allocation10 + $0x8] sm:$0xff] %v258_v16  ;;  %v257_v18 = vadd.f32 %v284_v12, %v242_v17 }
 0x101   :  { %259 = vst [vmem:[#allocation10] sm:$0xff] %v257_v18 }
 0x102   :  { %411 = shalt.err (!%p408_p10)
}
 0x103   :  { %272 = dma.vmem_to_hbm [thread:$0]  %s267_s14, 256, %s503_s5, [#allocation4], %s430_s23, %s430_s23, %s431_s24  }
 0x104   :  { %426 = dma.done.wait [#allocation4], 256  }
 0x105   :  { %427 = vsyncadd [#allocation4], 4294967040 }
 0x106   :  { %276 = vsyncpa [#allocation3], 1 }
 0x107   :  { %277 = vsyncpa [#allocation6], 1 }
 0x108   :  { %278 = vsyncpa [#allocation9], 1 }
 0x109   :  { %279 = vsyncpa [#allocation4], 1 }

</bundles_post_ra>
